<compile_context>
chip_gen: v5e
topology: v5e:2x2
jax: 0.10.0
libtpu: 0.0.40
codegen_flags: <defaults>
</compile_context>

<pallas_src>
import functools

import jax
import jax.numpy as jnp
import numpy as np
from jax import lax
from jax.experimental import pallas as pl
from jax.experimental.pallas import tpu as pltpu

EPS = 1e-5


# ----------------------------------------------------------------------------
# Fused Pallas kernel: conv3x3 -> BN(batch stats) -> ReLU, twice.
# Layout: channels on sublanes, flattened pixels (n, r, c) on lanes.
# ----------------------------------------------------------------------------
def _double_conv_kernel(a0_ref, pack_ref, masks_ref, o_ref,
                        *, offsets, k1, k2, w2_off):
    # a0:    (Cin_p, L)   pooled input, channel-major, zero-padded channels
    # pack:  (Cout, w2_off + k2 + 4) packed [W1m | pad | W2m | g1 be1 g2 be2]
    # masks: (9, L)       lane-dense per-tap validity (restores conv zero pad)
    # o:     (Cout, L)    lane-dense output
    L = a0_ref.shape[1]
    inv_n = 1.0 / float(L)

    a0 = a0_ref[...]
    masks = masks_ref[...]
    pack = pack_ref[...]
    w1 = pack[:, :k1]                                  # (Cout, 9*Cin_p)
    w2 = pack[:, w2_off:w2_off + k2]                   # (Cout, 9*Cout)
    bn = pack[:, w2_off + k2:w2_off + k2 + 4]          # (Cout, 4)
    g1, be1, g2, be2 = (bn[:, 0:1], bn[:, 1:2], bn[:, 2:3], bn[:, 3:4])

    def im2col(a):
        # a: (C, L) -> (9*C, L).  Each tap is a static lane roll (XLU) of the
        # whole activation; the lane-dense mask re-applies the zero padding at
        # image row/col boundaries (and kills circular wrap / cross-image
        # bleed, which only ever lands on masked-out positions).
        taps = []
        for k, off in enumerate(offsets):
            shifted = a if off == 0 else pltpu.roll(a, shift=(-off) % L, axis=1)
            taps.append(shifted * masks[k:k + 1, :])
        return jnp.concatenate(taps, axis=0)

    def bn_relu(y, g, be):
        # BatchNorm (training mode -> batch statistics over all L pixels per
        # channel), centered two-pass variance, fused with the affine + ReLU.
        mean = jnp.sum(y, axis=1, keepdims=True) * inv_n          # (Cout, 1)
        d = y - mean
        var = jnp.sum(d * d, axis=1, keepdims=True) * inv_n
        return jnp.maximum(d * (g * lax.rsqrt(var + EPS)) + be, 0.0)

    # conv1: one MXU dot (Cout, k1) x (k1, L); conv bias folded away by BN.
    y1 = jnp.dot(w1, im2col(a0), preferred_element_type=jnp.float32)
    a1 = bn_relu(y1, g1, be1)                                     # (Cout, L)
    # conv2: one MXU dot (Cout, k2) x (k2, L).
    y2 = jnp.dot(w2, im2col(a1), preferred_element_type=jnp.float32)
    o_ref[...] = bn_relu(y2, g2, be2)                             # lane-dense


# ----------------------------------------------------------------------------
# Static 3x3 tap offsets (flat pixel shifts) and lane-dense validity masks.
# ----------------------------------------------------------------------------
def _build_tap_masks(N, Hp, Wp):
    L = N * Hp * Wp
    l = np.arange(L)
    r = (l // Wp) % Hp
    c = l % Wp
    offsets, taps = [], []
    for dy in (-1, 0, 1):
        for dx in (-1, 0, 1):
            offsets.append(int(dy * Wp + dx))
            ok = (r + dy >= 0) & (r + dy < Hp) & (c + dx >= 0) & (c + dx < Wp)
            taps.append(ok.astype(np.float32))
    return tuple(offsets), np.stack(taps, axis=0)            # (9, L)


def _padded_bytes(shape, itemsize=4):
    rows = -(-shape[0] // 8) * 8
    cols = -(-shape[1] // 128) * 128
    return int(rows * cols * itemsize)


# ----------------------------------------------------------------------------
# Wrapper: Down.forward (NCHW in / NCHW out).
# ----------------------------------------------------------------------------
def down_forward(x_nchw, params):
    N, Cin, H, W = x_nchw.shape
    assert H % 2 == 0 and W % 2 == 0
    Hp, Wp = H // 2, W // 2
    L = N * Hp * Wp
    Cmid = params['w1'].shape[-1]
    Cout = params['w2'].shape[-1]
    assert Cmid == Cout                      # DoubleConv uses out_channels twice
    Cin_p = -(-Cin // 8) * 8                 # pad conv1 input channels to a sublane tile
    k1, k2 = 9 * Cin_p, 9 * Cout
    w2_off = -(-k1 // 128) * 128             # W2 starts on a vreg lane boundary

    x = x_nchw.astype(jnp.float32)

    # --- tiny XLA glue: MaxPool2d(2) + NCHW -> (C, pixels) channel-major pack.
    pooled = jnp.max(x.reshape(N, Cin, Hp, 2, Wp, 2), axis=(3, 5))  # (N,Cin,Hp,Wp)
    a0 = jnp.transpose(pooled, (1, 0, 2, 3)).reshape(Cin, L)        # (Cin, L)
    a0 = jnp.pad(a0, ((0, Cin_p - Cin), (0, 0)))                    # (Cin_p, L)

    # --- pack conv weights (im2col layout, contraction index = tap*C + ci)
    #     and the 4 BatchNorm vectors into a single parameter block.
    w1 = params['w1'].astype(jnp.float32)                 # (3,3,Cin,Cmid) HWIO
    w2 = params['w2'].astype(jnp.float32)                 # (3,3,Cmid,Cout)
    w1m = jnp.transpose(w1, (3, 0, 1, 2)).reshape(Cmid, 9, Cin)
    w1m = jnp.pad(w1m, ((0, 0), (0, 0), (0, Cin_p - Cin))).reshape(Cmid, k1)
    w2m = jnp.transpose(w2, (3, 0, 1, 2)).reshape(Cout, k2)
    gap = jnp.zeros((Cout, w2_off - k1), jnp.float32)
    bn_cols = [params[k].astype(jnp.float32).reshape(Cout, 1)
               for k in ('g1', 'be1', 'g2', 'be2')]
    pack = jnp.concatenate([w1m, gap, w2m] + bn_cols, axis=1)  # (Cout, w2_off+k2+4)

    offsets, masks_np = _build_tap_masks(N, Hp, Wp)
    masks = jnp.asarray(masks_np)                               # (9, L) lane-dense

    flops = 2 * L * (k1 + k2) * Cout + 40 * Cout * L
    bytes_accessed = (_padded_bytes((Cin_p, L)) + _padded_bytes(pack.shape)
                      + _padded_bytes((9, L)) + _padded_bytes((Cout, L)))

    kernel = functools.partial(_double_conv_kernel, offsets=offsets,
                               k1=k1, k2=k2, w2_off=w2_off)
    out_cl = pl.pallas_call(
        kernel,
        out_shape=jax.ShapeDtypeStruct((Cout, L), jnp.float32),
        cost_estimate=pl.CostEstimate(flops=int(flops),
                                      transcendentals=int(2 * Cout),
                                      bytes_accessed=int(bytes_accessed)),
    )(a0, pack, masks)

    # (Cout, N*Hp*Wp) -> NCHW
    return out_cl.reshape(Cout, N, Hp, Wp).transpose(1, 0, 2, 3)


# ----------------------------------------------------------------------------
# Pure-JAX reference (PyTorch Down, training-mode BN, with conv biases).
# ----------------------------------------------------------------------------
def down_forward_ref(x_nchw, p):
    x = x_nchw.astype(jnp.float32)
    N, Cin, H, W = x.shape
    pooled = jnp.max(x.reshape(N, Cin, H // 2, 2, W // 2, 2), axis=(3, 5))
    y = jnp.transpose(pooled, (0, 2, 3, 1))                     # NHWC

    def conv(z, w, b):
        out = lax.conv_general_dilated(
            z, w, window_strides=(1, 1), padding=((1, 1), (1, 1)),
            dimension_numbers=('NHWC', 'HWIO', 'NHWC'))
        return out + b

    def bn_relu(t, gamma, beta):
        m = jnp.mean(t, axis=(0, 1, 2))
        v = jnp.var(t, axis=(0, 1, 2))
        return jnp.maximum((t - m) / jnp.sqrt(v + EPS) * gamma + beta, 0.0)

    y = bn_relu(conv(y, p['w1'], p['b1']), p['g1'], p['be1'])
    y = bn_relu(conv(y, p['w2'], p['b2']), p['g2'], p['be2'])
    return jnp.transpose(y, (0, 3, 1, 2))


# ----------------------------------------------------------------------------
# Main
# ----------------------------------------------------------------------------
if __name__ == "__main__":
    # Down(in_channels=4, out_channels=8): x (2, 4, 16, 16) -> (2, 8, 8, 8)
    N, Cin, H, W = 2, 4, 16, 16
    Cout = 8

    key = jax.random.PRNGKey(0)
    ks = jax.random.split(key, 9)
    x = jax.random.normal(ks[0], (N, Cin, H, W), jnp.float32)

    params = {
        'w1': 0.1 * jax.random.normal(ks[1], (3, 3, Cin, Cout), jnp.float32),
        'b1': 0.05 * jax.random.normal(ks[2], (Cout,), jnp.float32),
        'g1': 1.0 + 0.1 * jax.random.normal(ks[3], (Cout,), jnp.float32),
        'be1': 0.1 * jax.random.normal(ks[4], (Cout,), jnp.float32),
        'w2': 0.1 * jax.random.normal(ks[5], (3, 3, Cout, Cout), jnp.float32),
        'b2': 0.05 * jax.random.normal(ks[6], (Cout,), jnp.float32),
        'g2': 1.0 + 0.1 * jax.random.normal(ks[7], (Cout,), jnp.float32),
        'be2': 0.1 * jax.random.normal(ks[8], (Cout,), jnp.float32),
    }

    out = jax.block_until_ready(jax.jit(down_forward)(x, params))
    ref = jax.block_until_ready(down_forward_ref(x, params))

    assert out.shape == (N, Cout, H // 2, W // 2), out.shape
    max_err = float(jnp.max(jnp.abs(out - ref)))
    if not np.isfinite(max_err) or max_err > 1e-3:
        raise AssertionError(f"mismatch vs reference, max abs err = {max_err}")

    print("KERNEL_OK")
</pallas_src>

<mosaic_0001>
module attributes {stable_mosaic.version = 11 : i64} {
  func.func @_double_conv_kernel(%arg0: memref<8x128xf32, #tpu.memory_space<vmem>>, %arg1: memref<8x204xf32, #tpu.memory_space<vmem>>, %arg2: memref<9x128xf32, #tpu.memory_space<vmem>>, %arg3: memref<8x128xf32, #tpu.memory_space<vmem>>) attributes {dimension_semantics = [], scalar_prefetch = 0 : i64, scratch_operands = 0 : i64, tpu.core_type = #tpu.core_type<tc>} {
    %c0 = arith.constant 0 : index
    %c0_0 = arith.constant 0 : index
    %0 = vector.load %arg0[%c0, %c0_0] : memref<8x128xf32, #tpu.memory_space<vmem>>, vector<8x128xf32>
    %c0_1 = arith.constant 0 : index
    %c0_2 = arith.constant 0 : index
    %1 = vector.load %arg2[%c0_1, %c0_2] : memref<9x128xf32, #tpu.memory_space<vmem>>, vector<9x128xf32>
    %c0_3 = arith.constant 0 : index
    %c0_4 = arith.constant 0 : index
    %2 = vector.load %arg1[%c0_3, %c0_4] : memref<8x204xf32, #tpu.memory_space<vmem>>, vector<8x204xf32>
    %3 = vector.extract_strided_slice %2 {offsets = [0, 0], sizes = [8, 72], strides = [1, 1]} : vector<8x204xf32> to vector<8x72xf32>
    %4 = vector.extract_strided_slice %2 {offsets = [0, 128], sizes = [8, 72], strides = [1, 1]} : vector<8x204xf32> to vector<8x72xf32>
    %5 = vector.extract_strided_slice %2 {offsets = [0, 200], sizes = [8, 4], strides = [1, 1]} : vector<8x204xf32> to vector<8x4xf32>
    %6 = vector.extract_strided_slice %5 {offsets = [0, 0], sizes = [8, 1], strides = [1, 1]} : vector<8x4xf32> to vector<8x1xf32>
    %7 = vector.extract_strided_slice %5 {offsets = [0, 1], sizes = [8, 1], strides = [1, 1]} : vector<8x4xf32> to vector<8x1xf32>
    %8 = vector.extract_strided_slice %5 {offsets = [0, 2], sizes = [8, 1], strides = [1, 1]} : vector<8x4xf32> to vector<8x1xf32>
    %9 = vector.extract_strided_slice %5 {offsets = [0, 3], sizes = [8, 1], strides = [1, 1]} : vector<8x4xf32> to vector<8x1xf32>
    %c9_i32 = arith.constant 9 : i32
    %10 = tpu.dynamic_rotate %0 by %c9_i32 dim 1 : vector<8x128xf32>, i32 -> vector<8x128xf32>
    %11 = vector.extract_strided_slice %1 {offsets = [0, 0], sizes = [1, 128], strides = [1, 1]} : vector<9x128xf32> to vector<1x128xf32>
    %12 = vector.broadcast %11 : vector<1x128xf32> to vector<8x128xf32>
    %13 = arith.mulf %10, %12 : vector<8x128xf32>
    %c8_i32 = arith.constant 8 : i32
    %14 = tpu.dynamic_rotate %0 by %c8_i32 dim 1 : vector<8x128xf32>, i32 -> vector<8x128xf32>
    %15 = vector.extract_strided_slice %1 {offsets = [1, 0], sizes = [1, 128], strides = [1, 1]} : vector<9x128xf32> to vector<1x128xf32>
    %16 = vector.broadcast %15 : vector<1x128xf32> to vector<8x128xf32>
    %17 = arith.mulf %14, %16 : vector<8x128xf32>
    %c7_i32 = arith.constant 7 : i32
    %18 = tpu.dynamic_rotate %0 by %c7_i32 dim 1 : vector<8x128xf32>, i32 -> vector<8x128xf32>
    %19 = vector.extract_strided_slice %1 {offsets = [2, 0], sizes = [1, 128], strides = [1, 1]} : vector<9x128xf32> to vector<1x128xf32>
    %20 = vector.broadcast %19 : vector<1x128xf32> to vector<8x128xf32>
    %21 = arith.mulf %18, %20 : vector<8x128xf32>
    %c1_i32 = arith.constant 1 : i32
    %22 = tpu.dynamic_rotate %0 by %c1_i32 dim 1 : vector<8x128xf32>, i32 -> vector<8x128xf32>
    %23 = vector.extract_strided_slice %1 {offsets = [3, 0], sizes = [1, 128], strides = [1, 1]} : vector<9x128xf32> to vector<1x128xf32>
    %24 = vector.broadcast %23 : vector<1x128xf32> to vector<8x128xf32>
    %25 = arith.mulf %22, %24 : vector<8x128xf32>
    %26 = vector.extract_strided_slice %1 {offsets = [4, 0], sizes = [1, 128], strides = [1, 1]} : vector<9x128xf32> to vector<1x128xf32>
    %27 = vector.broadcast %26 : vector<1x128xf32> to vector<8x128xf32>
    %28 = arith.mulf %0, %27 : vector<8x128xf32>
    %c127_i32 = arith.constant 127 : i32
    %29 = tpu.dynamic_rotate %0 by %c127_i32 dim 1 : vector<8x128xf32>, i32 -> vector<8x128xf32>
    %30 = vector.extract_strided_slice %1 {offsets = [5, 0], sizes = [1, 128], strides = [1, 1]} : vector<9x128xf32> to vector<1x128xf32>
    %31 = vector.broadcast %30 : vector<1x128xf32> to vector<8x128xf32>
    %32 = arith.mulf %29, %31 : vector<8x128xf32>
    %c121_i32 = arith.constant 121 : i32
    %33 = tpu.dynamic_rotate %0 by %c121_i32 dim 1 : vector<8x128xf32>, i32 -> vector<8x128xf32>
    %34 = vector.extract_strided_slice %1 {offsets = [6, 0], sizes = [1, 128], strides = [1, 1]} : vector<9x128xf32> to vector<1x128xf32>
    %35 = vector.broadcast %34 : vector<1x128xf32> to vector<8x128xf32>
    %36 = arith.mulf %33, %35 : vector<8x128xf32>
    %c120_i32 = arith.constant 120 : i32
    %37 = tpu.dynamic_rotate %0 by %c120_i32 dim 1 : vector<8x128xf32>, i32 -> vector<8x128xf32>
    %38 = vector.extract_strided_slice %1 {offsets = [7, 0], sizes = [1, 128], strides = [1, 1]} : vector<9x128xf32> to vector<1x128xf32>
    %39 = vector.broadcast %38 : vector<1x128xf32> to vector<8x128xf32>
    %40 = arith.mulf %37, %39 : vector<8x128xf32>
    %c119_i32 = arith.constant 119 : i32
    %41 = tpu.dynamic_rotate %0 by %c119_i32 dim 1 : vector<8x128xf32>, i32 -> vector<8x128xf32>
    %42 = vector.extract_strided_slice %1 {offsets = [8, 0], sizes = [1, 128], strides = [1, 1]} : vector<9x128xf32> to vector<1x128xf32>
    %43 = vector.broadcast %42 : vector<1x128xf32> to vector<8x128xf32>
    %44 = arith.mulf %41, %43 : vector<8x128xf32>
    %45 = tpu.concatenate %13, %17, %21, %25, %28, %32, %36, %40, %44 in 0 : vector<8x128xf32>, vector<8x128xf32>, vector<8x128xf32>, vector<8x128xf32>, vector<8x128xf32>, vector<8x128xf32>, vector<8x128xf32>, vector<8x128xf32>, vector<8x128xf32> -> vector<72x128xf32>
    %cst = arith.constant dense<0.000000e+00> : vector<8x128xf32>
    %46 = tpu.matmul %3, %45, %cst {dimension_numbers = #tpu.dot_dimension_numbers<[1], [0], [0], [1], [0, 0, 1, 1], [], []>} : vector<8x72xf32>, vector<72x128xf32>, vector<8x128xf32> -> vector<8x128xf32>
    %cst_5 = arith.constant dense<0.000000e+00> : vector<8xf32>
    %47 = vector.multi_reduction <add>, %46, %cst_5 [1] : vector<8x128xf32> to vector<8xf32>
    %48 = vector.shape_cast %47 : vector<8xf32> to vector<8x1xf32>
    %cst_6 = arith.constant 7.812500e-03 : f32
    %49 = vector.broadcast %cst_6 : f32 to vector<8x1xf32>
    %50 = arith.mulf %48, %49 : vector<8x1xf32>
    %51 = vector.broadcast %50 : vector<8x1xf32> to vector<8x128xf32>
    %52 = arith.subf %46, %51 : vector<8x128xf32>
    %53 = arith.mulf %52, %52 : vector<8x128xf32>
    %cst_7 = arith.constant dense<0.000000e+00> : vector<8xf32>
    %54 = vector.multi_reduction <add>, %53, %cst_7 [1] : vector<8x128xf32> to vector<8xf32>
    %55 = vector.shape_cast %54 : vector<8xf32> to vector<8x1xf32>
    %cst_8 = arith.constant 7.812500e-03 : f32
    %56 = vector.broadcast %cst_8 : f32 to vector<8x1xf32>
    %57 = arith.mulf %55, %56 : vector<8x1xf32>
    %cst_9 = arith.constant 9.99999974E-6 : f32
    %58 = vector.broadcast %cst_9 : f32 to vector<8x1xf32>
    %59 = arith.addf %57, %58 : vector<8x1xf32>
    %60 = math.rsqrt %59 : vector<8x1xf32>
    %61 = arith.mulf %6, %60 : vector<8x1xf32>
    %62 = vector.broadcast %61 : vector<8x1xf32> to vector<8x128xf32>
    %63 = arith.mulf %52, %62 : vector<8x128xf32>
    %64 = vector.broadcast %7 : vector<8x1xf32> to vector<8x128xf32>
    %65 = arith.addf %63, %64 : vector<8x128xf32>
    %cst_10 = arith.constant 0.000000e+00 : f32
    %66 = vector.broadcast %cst_10 : f32 to vector<8x128xf32>
    %67 = arith.maximumf %65, %66 : vector<8x128xf32>
    %c9_i32_11 = arith.constant 9 : i32
    %68 = tpu.dynamic_rotate %67 by %c9_i32_11 dim 1 : vector<8x128xf32>, i32 -> vector<8x128xf32>
    %69 = vector.extract_strided_slice %1 {offsets = [0, 0], sizes = [1, 128], strides = [1, 1]} : vector<9x128xf32> to vector<1x128xf32>
    %70 = vector.broadcast %69 : vector<1x128xf32> to vector<8x128xf32>
    %71 = arith.mulf %68, %70 : vector<8x128xf32>
    %c8_i32_12 = arith.constant 8 : i32
    %72 = tpu.dynamic_rotate %67 by %c8_i32_12 dim 1 : vector<8x128xf32>, i32 -> vector<8x128xf32>
    %73 = vector.extract_strided_slice %1 {offsets = [1, 0], sizes = [1, 128], strides = [1, 1]} : vector<9x128xf32> to vector<1x128xf32>
    %74 = vector.broadcast %73 : vector<1x128xf32> to vector<8x128xf32>
    %75 = arith.mulf %72, %74 : vector<8x128xf32>
    %c7_i32_13 = arith.constant 7 : i32
    %76 = tpu.dynamic_rotate %67 by %c7_i32_13 dim 1 : vector<8x128xf32>, i32 -> vector<8x128xf32>
    %77 = vector.extract_strided_slice %1 {offsets = [2, 0], sizes = [1, 128], strides = [1, 1]} : vector<9x128xf32> to vector<1x128xf32>
    %78 = vector.broadcast %77 : vector<1x128xf32> to vector<8x128xf32>
    %79 = arith.mulf %76, %78 : vector<8x128xf32>
    %c1_i32_14 = arith.constant 1 : i32
    %80 = tpu.dynamic_rotate %67 by %c1_i32_14 dim 1 : vector<8x128xf32>, i32 -> vector<8x128xf32>
    %81 = vector.extract_strided_slice %1 {offsets = [3, 0], sizes = [1, 128], strides = [1, 1]} : vector<9x128xf32> to vector<1x128xf32>
    %82 = vector.broadcast %81 : vector<1x128xf32> to vector<8x128xf32>
    %83 = arith.mulf %80, %82 : vector<8x128xf32>
    %84 = vector.extract_strided_slice %1 {offsets = [4, 0], sizes = [1, 128], strides = [1, 1]} : vector<9x128xf32> to vector<1x128xf32>
    %85 = vector.broadcast %84 : vector<1x128xf32> to vector<8x128xf32>
    %86 = arith.mulf %67, %85 : vector<8x128xf32>
    %c127_i32_15 = arith.constant 127 : i32
    %87 = tpu.dynamic_rotate %67 by %c127_i32_15 dim 1 : vector<8x128xf32>, i32 -> vector<8x128xf32>
    %88 = vector.extract_strided_slice %1 {offsets = [5, 0], sizes = [1, 128], strides = [1, 1]} : vector<9x128xf32> to vector<1x128xf32>
    %89 = vector.broadcast %88 : vector<1x128xf32> to vector<8x128xf32>
    %90 = arith.mulf %87, %89 : vector<8x128xf32>
    %c121_i32_16 = arith.constant 121 : i32
    %91 = tpu.dynamic_rotate %67 by %c121_i32_16 dim 1 : vector<8x128xf32>, i32 -> vector<8x128xf32>
    %92 = vector.extract_strided_slice %1 {offsets = [6, 0], sizes = [1, 128], strides = [1, 1]} : vector<9x128xf32> to vector<1x128xf32>
    %93 = vector.broadcast %92 : vector<1x128xf32> to vector<8x128xf32>
    %94 = arith.mulf %91, %93 : vector<8x128xf32>
    %c120_i32_17 = arith.constant 120 : i32
    %95 = tpu.dynamic_rotate %67 by %c120_i32_17 dim 1 : vector<8x128xf32>, i32 -> vector<8x128xf32>
    %96 = vector.extract_strided_slice %1 {offsets = [7, 0], sizes = [1, 128], strides = [1, 1]} : vector<9x128xf32> to vector<1x128xf32>
    %97 = vector.broadcast %96 : vector<1x128xf32> to vector<8x128xf32>
    %98 = arith.mulf %95, %97 : vector<8x128xf32>
    %c119_i32_18 = arith.constant 119 : i32
    %99 = tpu.dynamic_rotate %67 by %c119_i32_18 dim 1 : vector<8x128xf32>, i32 -> vector<8x128xf32>
    %100 = vector.extract_strided_slice %1 {offsets = [8, 0], sizes = [1, 128], strides = [1, 1]} : vector<9x128xf32> to vector<1x128xf32>
    %101 = vector.broadcast %100 : vector<1x128xf32> to vector<8x128xf32>
    %102 = arith.mulf %99, %101 : vector<8x128xf32>
    %103 = tpu.concatenate %71, %75, %79, %83, %86, %90, %94, %98, %102 in 0 : vector<8x128xf32>, vector<8x128xf32>, vector<8x128xf32>, vector<8x128xf32>, vector<8x128xf32>, vector<8x128xf32>, vector<8x128xf32>, vector<8x128xf32>, vector<8x128xf32> -> vector<72x128xf32>
    %cst_19 = arith.constant dense<0.000000e+00> : vector<8x128xf32>
    %104 = tpu.matmul %4, %103, %cst_19 {dimension_numbers = #tpu.dot_dimension_numbers<[1], [0], [0], [1], [0, 0, 1, 1], [], []>} : vector<8x72xf32>, vector<72x128xf32>, vector<8x128xf32> -> vector<8x128xf32>
    %cst_20 = arith.constant dense<0.000000e+00> : vector<8xf32>
    %105 = vector.multi_reduction <add>, %104, %cst_20 [1] : vector<8x128xf32> to vector<8xf32>
    %106 = vector.shape_cast %105 : vector<8xf32> to vector<8x1xf32>
    %cst_21 = arith.constant 7.812500e-03 : f32
    %107 = vector.broadcast %cst_21 : f32 to vector<8x1xf32>
    %108 = arith.mulf %106, %107 : vector<8x1xf32>
    %109 = vector.broadcast %108 : vector<8x1xf32> to vector<8x128xf32>
    %110 = arith.subf %104, %109 : vector<8x128xf32>
    %111 = arith.mulf %110, %110 : vector<8x128xf32>
    %cst_22 = arith.constant dense<0.000000e+00> : vector<8xf32>
    %112 = vector.multi_reduction <add>, %111, %cst_22 [1] : vector<8x128xf32> to vector<8xf32>
    %113 = vector.shape_cast %112 : vector<8xf32> to vector<8x1xf32>
    %cst_23 = arith.constant 7.812500e-03 : f32
    %114 = vector.broadcast %cst_23 : f32 to vector<8x1xf32>
    %115 = arith.mulf %113, %114 : vector<8x1xf32>
    %cst_24 = arith.constant 9.99999974E-6 : f32
    %116 = vector.broadcast %cst_24 : f32 to vector<8x1xf32>
    %117 = arith.addf %115, %116 : vector<8x1xf32>
    %118 = math.rsqrt %117 : vector<8x1xf32>
    %119 = arith.mulf %8, %118 : vector<8x1xf32>
    %120 = vector.broadcast %119 : vector<8x1xf32> to vector<8x128xf32>
    %121 = arith.mulf %110, %120 : vector<8x128xf32>
    %122 = vector.broadcast %9 : vector<8x1xf32> to vector<8x128xf32>
    %123 = arith.addf %121, %122 : vector<8x128xf32>
    %cst_25 = arith.constant 0.000000e+00 : f32
    %124 = vector.broadcast %cst_25 : f32 to vector<8x128xf32>
    %125 = arith.maximumf %123, %124 : vector<8x128xf32>
    %c0_26 = arith.constant 0 : index
    %c0_27 = arith.constant 0 : index
    %126 = vector.load %arg3[%c0_26, %c0_27] : memref<8x128xf32, #tpu.memory_space<vmem>>, vector<8x128xf32>
    tpu.vector_store %arg3[%c0_26, %c0_27], %125 {strides = array<i32>} : memref<8x128xf32, #tpu.memory_space<vmem>>, vector<8x128xf32>,
    return
  }
}

</mosaic_0001>

<bundles_post_ra>
// kernel: down_forward.1
= control target key start
LH: loop header
LB: loop body
LE: loop exit
PB: predicated region body
PF: predicated region fallthrough
CT: control target
= control target key end

     0   :  { %s218_s14 = smov 119   ;;  %s219_s15 = smov 121   ;;  %vm53_vm0 = vcmask 588800   ;;  %v226_v34 = vmov 72   ;;  %v227_v47 = vmov 73   ;;  %s339_s0 = inlined_call_operand.vmem [shape: f32[8,128], index: 0, kind: input, shape index: {}]   ;;  %s340_s2 = inlined_call_operand.vmem [shape: f32[9,128], index: 2, kind: input, shape index: {}]   ;;  %s341_s1 = inlined_call_operand.vmem [shape: f32[8,204], index: 1, kind: input, shape index: {}]   ;;  %s342_s3 = inlined_call_operand.vmem [shape: f32[8,128], index: 3, kind: output, shape index: {}]  }
   0x1   :  { %v14_v0 = vld [vmem:[%s339_s0] sm:$0xff]  ;;  %s220_s16 = smov 1   ;;  %s221_s17 = smov 120   ;;  %v264_v1 = vld [vmem:[%s340_s2 + $0x8] ss:$0 sm:$0xff]  ;;  %208 = vset.pattern.permute.xlu1 %v226_v34 }
   0x2   :  { %49 = vrot.lane.b32.xlu0 %v14_v0, %s218_s14  ;;  %41 = vrot.lane.b32.xlu1 %v14_v0, %s219_s15  ;;  %s222_s18 = smov 127   ;;  %s223_s19 = smov 7   ;;  %v270_v5 = vld [vmem:[%s340_s2] sm:$0xff]  ;;  %v303_v43 = vld [vmem:[%s341_s1 + $0x8] sm:$0xff] }
   0x3   :  { %31 = vrot.lane.b32.xlu2 %v14_v0, %s220_s16  ;;  %s224_s20 = smov 8   ;;  %s225_s0 = smov 9   ;;  %v47_v7 = vperm.slane %v270_v5, 7  ;;  %v43_v8 = vperm.slane %v270_v5, 6  ;;  %v39_v9 = vperm.slane %v270_v5, 5  ;;  %v35_v13 = vperm.slane %v270_v5, 4 }
   0x4   :  { %v33_v16 = vperm.slane %v270_v5, 3  ;;  %v29_v18 = vperm.slane %v270_v5, 2  ;;  %v25_v20 = vperm.slane %v270_v5, 1  ;;  %v21_v24 = vperm.slane %v270_v5, 0  ;;  %v17_v28 = vld [vmem:[%s341_s1] sm:$0xff] }
   0x5   :  { %v36_v17 = vmul.f32 %v35_v13, %v14_v0 }
   0xa   :  { %45 = vrot.lane.b32.xlu0 %v14_v0, %s221_s17  ;;  %37 = vrot.lane.b32.xlu1 %v14_v0, %s222_s18 }
   0xb   :  { %27 = vrot.lane.b32.xlu2 %v14_v0, %s223_s19 }
  0x12   :  { %23 = vrot.lane.b32.xlu0 %v14_v0, %s224_s20  ;;  %19 = vrot.lane.b32.xlu1 %v14_v0, %s225_s0 }
  0x5d   :  { %v32_v6 = vpop.permute.xlu2 %31 }
  0x5e   :  { %v34_v22 = vmul.f32 %v33_v16, %v32_v6 }
  0x65   :  { %v28_v19 = vpop.permute.xlu2 %27 }
  0x66   :  { %v30_v23 = vmul.f32 %v29_v18, %v28_v19 }
  0x74   :  { %v50_v2 = vpop.permute.xlu0 %49  ;;  %v42_v3 = vpop.permute.xlu1 %41 }
  0x75   :  { %v52_v4 = vmul.f32 %v264_v1, %v50_v2  ;;  %v44_v14 = vmul.f32 %v43_v8, %v42_v3 }
  0x77   :  { %64 = vmatpush.msra.mxu0 %v52_v4 }
  0x7c   :  { %v46_v10 = vpop.permute.xlu0 %45  ;;  %v38_v11 = vpop.permute.xlu1 %37 }
  0x7d   :  { %v48_v12 = vmul.f32 %v47_v7, %v46_v10  ;;  %v40_v15 = vmul.f32 %v39_v9, %v38_v11 }
  0x7f   :  { %65 = vmatpush.msra.mxu0 %v48_v12  ;;  %v228_v12 = vmov 74  }
  0x81   :  { %66 = vmatpush.msra.mxu0 %v44_v14 }
  0x83   :  { %67 = vmatpush.msra.mxu0 %v40_v15 }
  0x84   :  { %v24_v21 = vpop.permute.xlu0 %23  ;;  %v20_v25 = vpop.permute.xlu1 %19 }
  0x85   :  { %68 = vmatpush.msra.mxu0 %v36_v17  ;;  %v26_v26 = vmul.f32 %v25_v20, %v24_v21  ;;  %v22_v27 = vmul.f32 %v21_v24, %v20_v25 }
  0x87   :  { %69 = vmatpush.msra.mxu0 %v34_v22 }
  0x89   :  { %70 = vmatpush.msra.mxu0 %v30_v23 }
  0x8b   :  { %71 = vmatpush.msra.mxu0 %v26_v26 }
  0x8d   :  { %72 = vmatpush.msra.mxu0 %v22_v27 }
  0x8e   :  { %194 = vmatmul.msk.f32.vlgmr.msra.gmra.mxu0 %vm53_vm0, %v17_v28 }
 0x10b   :  { %v74_v29 = vpop.f32.mrf.mxu0 }
 0x10c   :  { %77 = vadd.xlane.f32.xlu2 %v74_v29 }
 0x17f   :  { %v78_v30 = vpop.xlane.xlu2 %77 }
 0x180   :  { %v79_v31 = vmul.f32 0.0078125, %v78_v30 }
 0x182   :  { %v80_v32 = vsub.f32 %v74_v29, %v79_v31 }
 0x184   :  { %v81_v33 = vmul.f32 %v80_v32, %v80_v32 }
 0x186   :  { %82 = vadd.xlane.f32.xlu0 %v81_v33 }
 0x1f9   :  { %v83_v35 = vpop.xlane.xlu0 %82 }
 0x1fa   :  { %v84_v36 = vmul.f32 0.0078125, %v83_v35 }
 0x1fc   :  { %v85_v37 = vadd.f32 1e-05, %v84_v36 }
 0x1fe   :  { %214 = vrsqrt.f32 %v85_v37  ;;  %vm92_vm2 = vweird.f32 %v85_v37 }
 0x204   :  { %v215_v38 = vpop.eup %214 }
 0x205   :  { %v87_v39 = vmul.f32 %v215_v38, %v85_v37  ;;  %vm93_vm1 = vweird.f32 %v215_v38 }
 0x206   :  { %vm94_vm3 = vmor %vm92_vm2, %vm93_vm1 }
 0x207   :  { %v88_v40 = vmul.f32 %v215_v38, %v87_v39 }
 0x209   :  { %v89_v41 = vmul.f32 0.5, %v88_v40 }
 0x20b   :  { %v90_v42 = vsub.f32 1.5, %v89_v41 }
 0x20d   :  { %v91_v44 = vmul.f32 %v215_v38, %v90_v42 }
 0x20f   :  { %v95_v45 = vsel %vm94_vm3, %v215_v38, %v91_v44 }
 0x210   :  { %v96_v46 = vmul.f32 %v95_v45, %v303_v43 }
 0x212   :  { %99 = vperm.xlu1 %208, %v96_v46  }
 0x21a   :  { %209 = vset.pattern.permute.xlu1 %v227_v47 }
 0x21b   :  { %105 = vperm.xlu1 %209, %v303_v43  }
 0x223   :  { %210 = vset.pattern.permute.xlu1 %v228_v12 }
 0x284   :  { %v100_v48 = vpop.permute.xlu1 %99 }
 0x285   :  { %v102_v49 = vmul.f32 %v100_v48, %v80_v32 }
 0x28d   :  { %v106_v50 = vpop.permute.xlu1 %105 }
 0x28e   :  { %v108_v51 = vadd.f32 %v106_v50, %v102_v49 }
 0x290   :  { %v109_v52 = vmax.f32 %v108_v51, 0.0 }
 0x292   :  { %116 = vrot.lane.b32.xlu0 %v109_v52, %s223_s19  ;;  %123 = vrot.lane.b32.xlu2 %v109_v52, %s222_s18  ;;  %v122_v61 = vmul.f32 %v109_v52, %v35_v13  ;;  %v229_v13 = vmov 75  }
 0x293   :  { %132 = vrot.lane.b32.xlu1 %v109_v52, %s218_s14  ;;  %212 = vset.pattern.permute.xlu0 %v229_v13 }
 0x29b   :  { %129 = vrot.lane.b32.xlu1 %v109_v52, %s221_s17 }
 0x2a3   :  { %126 = vrot.lane.b32.xlu1 %v109_v52, %s219_s15 }
 0x2ab   :  { %119 = vrot.lane.b32.xlu1 %v109_v52, %s220_s16 }
 0x2b3   :  { %113 = vrot.lane.b32.xlu1 %v109_v52, %s224_s20 }
 0x2bb   :  { %110 = vrot.lane.b32.xlu1 %v109_v52, %s225_s0 }
 0x2ec   :  { %v124_v57 = vpop.permute.xlu2 %123 }
 0x2ed   :  { %v125_v60 = vmul.f32 %v124_v57, %v39_v9 }
 0x304   :  { %v117_v62 = vpop.permute.xlu0 %116 }
 0x305   :  { %v133_v53 = vpop.permute.xlu1 %132 }
 0x306   :  { %v134_v54 = vmul.f32 %v264_v1, %v133_v53  ;;  %v118_v1 = vmul.f32 %v117_v62, %v29_v18 }
 0x308   :  { %144 = vmatpush.msra.mxu1 %v134_v54 }
 0x30d   :  { %v130_v55 = vpop.permute.xlu1 %129 }
 0x30e   :  { %v131_v56 = vmul.f32 %v130_v55, %v47_v7 }
 0x310   :  { %145 = vmatpush.msra.mxu1 %v131_v56 }
 0x315   :  { %v127_v58 = vpop.permute.xlu1 %126 }
 0x316   :  { %v128_v59 = vmul.f32 %v127_v58, %v43_v8 }
 0x318   :  { %146 = vmatpush.msra.mxu1 %v128_v59 }
 0x31a   :  { %147 = vmatpush.msra.mxu1 %v125_v60 }
 0x31c   :  { %148 = vmatpush.msra.mxu1 %v122_v61 }
 0x31d   :  { %v120_v63 = vpop.permute.xlu1 %119 }
 0x31e   :  { %v121_v0 = vmul.f32 %v120_v63, %v33_v16 }
 0x320   :  { %149 = vmatpush.msra.mxu1 %v121_v0 }
 0x322   :  { %150 = vmatpush.msra.mxu1 %v118_v1 }
 0x325   :  { %v114_v2 = vpop.permute.xlu1 %113 }
 0x326   :  { %v115_v3 = vmul.f32 %v114_v2, %v25_v20 }
 0x328   :  { %151 = vmatpush.msra.mxu1 %v115_v3 }
 0x32d   :  { %v111_v4 = vpop.permute.xlu1 %110 }
 0x32e   :  { %v112_v6 = vmul.f32 %v111_v4, %v21_v24 }
 0x330   :  { %152 = vmatpush.msra.mxu1 %v112_v6 }
 0x331   :  { %195 = vmatmul.msk.f32.vlgmr.msra.gmra.mxu1 %vm53_vm0, %v303_v43 }
 0x3ae   :  { %v154_v7 = vpop.f32.mrf.mxu1 }
 0x3af   :  { %157 = vadd.xlane.f32.xlu2 %v154_v7 }
 0x422   :  { %v158_v8 = vpop.xlane.xlu2 %157 }
 0x423   :  { %v159_v9 = vmul.f32 0.0078125, %v158_v8 }
 0x425   :  { %v160_v10 = vsub.f32 %v154_v7, %v159_v9 }
 0x427   :  { %v161_v11 = vmul.f32 %v160_v10, %v160_v10 }
 0x429   :  { %162 = vadd.xlane.f32.xlu0 %v161_v11 }
 0x49c   :  { %v163_v14 = vpop.xlane.xlu0 %162 }
 0x49d   :  { %v164_v15 = vmul.f32 0.0078125, %v163_v14 }
 0x49f   :  { %v165_v16 = vadd.f32 1e-05, %v164_v15 }
 0x4a1   :  { %216 = vrsqrt.f32 %v165_v16  ;;  %vm172_vm5 = vweird.f32 %v165_v16 }
 0x4a7   :  { %v217_v5 = vpop.eup %216 }
 0x4a8   :  { %v167_v17 = vmul.f32 %v217_v5, %v165_v16  ;;  %vm173_vm4 = vweird.f32 %v217_v5 }
 0x4a9   :  { %vm174_vm6 = vmor %vm172_vm5, %vm173_vm4 }
 0x4aa   :  { %v168_v18 = vmul.f32 %v217_v5, %v167_v17 }
 0x4ac   :  { %v169_v19 = vmul.f32 0.5, %v168_v18 }
 0x4ae   :  { %v170_v20 = vsub.f32 1.5, %v169_v19 }
 0x4b0   :  { %v171_v21 = vmul.f32 %v217_v5, %v170_v20 }
 0x4b2   :  { %v175_v22 = vsel %vm174_vm6, %v217_v5, %v171_v21 }
 0x4b3   :  { %v176_v23 = vmul.f32 %v175_v22, %v303_v43 }
 0x4b5   :  { %179 = vperm.xlu1 %210, %v176_v23  }
 0x4bd   :  { %211 = vset.pattern.permute.xlu1 %v229_v13 }
 0x4be   :  { %184 = vperm.xlu1 %211, %v303_v43  }
 0x527   :  { %v180_v24 = vpop.permute.xlu1 %179 }
 0x528   :  { %v182_v25 = vmul.f32 %v180_v24, %v160_v10 }
 0x530   :  { %v185_v26 = vpop.permute.xlu1 %184 }
 0x531   :  { %v187_v27 = vadd.f32 %v185_v26, %v182_v25 }
 0x533   :  { %v188_v28 = vmax.f32 %v187_v27, 0.0 }
 0x535   :  { %189 = vst [vmem:[%s342_s3] sm:$0xff] %v188_v28 }

</bundles_post_ra>
